<compile_context>
chip_gen: v7x
topology: tpu7x:2x2x1
jax: 0.10.0
libtpu: 0.0.40
codegen_flags: <defaults>
</compile_context>

<pallas_src>
import functools

import jax
import jax.numpy as jnp
import numpy as np
from jax import lax
from jax.experimental import pallas as pl
from jax.experimental.pallas import tpu as pltpu


def _round_up(n, m):
    return ((n + m - 1) // m) * m


def conv_lstm_cell_kernel(p_ref, c_ref, w_ref, b_ref, wci_ref, wcf_ref,
                          wco_ref, ch_ref, cc_ref, *, Ch):
    """One (batch, spatial-tile) grid step, channels-in-sublanes layout.

    p_ref   : (1, KKCp, NT) bf16  im2col patches of [x|h] (contraction zero-padded)
    c_ref   : (1, Ch, NT)   f32
    w_ref   : (4*Ch, KKCp)  bf16  gates packed [i|f|c|o] along rows
    b_ref   : (4*Ch, 1)     f32   (Wx* biases only; Wh* convs have no bias)
    wci/wcf/wco_ref : (Ch, NT) f32 peephole weights (shared across batch)
    ch_ref  : (1, Ch, NT)   input dtype
    cc_ref  : (1, Ch, NT)   f32
    """
    # One deep MXU matmul per grid step: (4Ch, KKCp) @ (KKCp, NT) -> f32 acc.
    acc = jnp.dot(w_ref[...], p_ref[0], preferred_element_type=jnp.float32)

    c = c_ref[0]                                        # (Ch, NT) f32

    # Gate extraction = clean sublane slices (Ch is a multiple of 8); bias is a
    # (Ch, 1) lane-broadcast folded into the epilogue rather than seeding acc.
    gi = acc[0 * Ch:1 * Ch, :] + b_ref[0 * Ch:1 * Ch]
    gf = acc[1 * Ch:2 * Ch, :] + b_ref[1 * Ch:2 * Ch]
    gc = acc[2 * Ch:3 * Ch, :] + b_ref[2 * Ch:3 * Ch]
    go = acc[3 * Ch:4 * Ch, :] + b_ref[3 * Ch:4 * Ch]

    # f32, lane-dense epilogue (last dim = NT).
    ci = jax.nn.sigmoid(gi + c * wci_ref[...])
    cf = jax.nn.sigmoid(gf + c * wcf_ref[...])
    cc = cf * c + ci * jnp.tanh(gc)
    co = jax.nn.sigmoid(go + cc * wco_ref[...])
    ch = co * jnp.tanh(cc)

    ch_ref[0] = ch.astype(ch_ref.dtype)
    cc_ref[0] = cc.astype(cc_ref.dtype)


def conv_lstm_cell_forward(x, h, c, params, *, kernel_size):
    """x: (B, Cin, H, W); h, c: (B, Ch, H, W) -- NCHW, same as PyTorch."""
    w, b, wci, wcf, wco = params        # packed layouts, see pack_params_for_kernel
    B, Cin, H, W = x.shape
    Ch = h.shape[1]
    K = kernel_size
    C = Cin + Ch
    pad = (K - 1) // 2
    HW = H * W
    KKC = K * K * C
    KKCp = w.shape[1]                   # contraction dim, padded to 128 multiple

    # --- wrapper glue (fused by XLA) ---------------------------------------
    # im2col in the channels-first layout (B, K*K*C, H*W): spatial stays in the
    # minor dims, so there is no NCHW<->NHWC transpose anywhere.
    xh = jnp.concatenate([x, h], axis=1)                     # (B, C, H, W)
    xh = jnp.pad(xh, ((0, 0), (0, 0), (pad, pad), (pad, pad)))
    taps = [xh[:, :, dy:dy + H, dx:dx + W]
            for dy in range(K) for dx in range(K)]
    patches = jnp.concatenate(taps, axis=1).reshape(B, KKC, HW)
    patches = jnp.pad(patches, ((0, 0), (0, KKCp - KKC), (0, 0)))
    patches = patches.astype(jnp.bfloat16)
    c2 = c.reshape(B, Ch, HW).astype(jnp.float32)            # pure reshape

    # Spatial tile in lanes (multiple of 128). Keep >= 2 parallel grid steps so
    # both v7x TensorCores get work even when B == 1.
    if HW % 256 == 0:
        nt = 256
    elif HW % 128 == 0:
        nt = 128
    else:
        nt = HW
    if B * (HW // nt) < 2 and nt >= 256 and HW % (nt // 2) == 0:
        nt //= 2
    n_tiles = HW // nt

    kernel = functools.partial(conv_lstm_cell_kernel, Ch=Ch)

    ch2, cc2 = pl.pallas_call(
        kernel,
        out_shape=(jax.ShapeDtypeStruct((B, Ch, HW), x.dtype),
                   jax.ShapeDtypeStruct((B, Ch, HW), jnp.float32)),
        grid_spec=pltpu.PrefetchScalarGridSpec(
            num_scalar_prefetch=0,
            grid=(B, n_tiles),
            in_specs=[
                pl.BlockSpec((1, KKCp, nt), lambda bi, ni: (bi, 0, ni)),   # patches
                pl.BlockSpec((1, Ch, nt), lambda bi, ni: (bi, 0, ni)),     # c
                pl.BlockSpec((4 * Ch, KKCp), lambda bi, ni: (0, 0)),       # weights
                pl.BlockSpec((4 * Ch, 1), lambda bi, ni: (0, 0)),          # bias
                pl.BlockSpec((Ch, nt), lambda bi, ni: (0, ni)),            # Wci
                pl.BlockSpec((Ch, nt), lambda bi, ni: (0, ni)),            # Wcf
                pl.BlockSpec((Ch, nt), lambda bi, ni: (0, ni)),            # Wco
            ],
            out_specs=[
                pl.BlockSpec((1, Ch, nt), lambda bi, ni: (bi, 0, ni)),     # ch
                pl.BlockSpec((1, Ch, nt), lambda bi, ni: (bi, 0, ni)),     # cc
            ],
        ),
        compiler_params=pltpu.CompilerParams(
            dimension_semantics=("parallel", "parallel")),
    )(patches, c2, w, b, wci, wcf, wco)

    # (B, Ch, HW) -> NCHW: pure reshapes.
    ch_out = ch2.reshape(B, Ch, H, W)
    cc_out = cc2.reshape(B, Ch, H, W)   # cell state intentionally stays f32
    return ch_out, cc_out


# ---------------------------------------------------------------------------
# Parameter construction (deterministic, PyTorch-shaped) + packing for kernel
# ---------------------------------------------------------------------------

def make_params(key, input_channels, hidden_channels, kernel_size, H, W):
    K = kernel_size
    ks = jax.random.split(key, 11)
    scale = 0.1
    # PyTorch-layout weights: (Cout, Cin, K, K); biases (Cout,)
    wxi = scale * jax.random.normal(ks[0], (hidden_channels, input_channels, K, K), jnp.float32)
    wxf = scale * jax.random.normal(ks[1], (hidden_channels, input_channels, K, K), jnp.float32)
    wxc = scale * jax.random.normal(ks[2], (hidden_channels, input_channels, K, K), jnp.float32)
    wxo = scale * jax.random.normal(ks[3], (hidden_channels, input_channels, K, K), jnp.float32)
    whi = scale * jax.random.normal(ks[4], (hidden_channels, hidden_channels, K, K), jnp.float32)
    whf = scale * jax.random.normal(ks[5], (hidden_channels, hidden_channels, K, K), jnp.float32)
    whc = scale * jax.random.normal(ks[6], (hidden_channels, hidden_channels, K, K), jnp.float32)
    who = scale * jax.random.normal(ks[7], (hidden_channels, hidden_channels, K, K), jnp.float32)
    bxi = scale * jax.random.normal(ks[8], (hidden_channels,), jnp.float32)
    bxf = scale * jax.random.normal(ks[9], (hidden_channels,), jnp.float32)
    bxc = scale * jax.random.normal(ks[10], (hidden_channels,), jnp.float32)
    bxo = jnp.zeros((hidden_channels,), jnp.float32)
    # Peephole weights: the PyTorch init_hidden makes them zeros; we use
    # deterministic non-zero values so the peephole path is actually exercised.
    kci, kcf, kco = jax.random.split(ks[0], 3)
    wci = scale * jax.random.normal(kci, (1, hidden_channels, H, W), jnp.float32)
    wcf = scale * jax.random.normal(kcf, (1, hidden_channels, H, W), jnp.float32)
    wco = scale * jax.random.normal(kco, (1, hidden_channels, H, W), jnp.float32)
    return dict(wxi=wxi, wxf=wxf, wxc=wxc, wxo=wxo,
                whi=whi, whf=whf, whc=whc, who=who,
                bxi=bxi, bxf=bxf, bxc=bxc, bxo=bxo,
                wci=wci, wcf=wcf, wco=wco)


def pack_params_for_kernel(p):
    Ch, Cin, K, _ = p["wxi"].shape
    C = Cin + Ch
    KKC = K * K * C
    KKCp = _round_up(KKC, 128)

    def gate(wx, wh):                       # fuse x- and h-weights along Cin
        return jnp.concatenate([wx, wh], axis=1)        # (Ch, C, K, K)

    w = jnp.concatenate([gate(p["wxi"], p["whi"]),
                         gate(p["wxf"], p["whf"]),
                         gate(p["wxc"], p["whc"]),
                         gate(p["wxo"], p["who"])], axis=0)   # (4Ch, C, K, K)
    # Flatten so the column index is (dy*K + dx)*C + cin, matching the im2col
    # tap ordering in the wrapper; zero-pad the contraction dim.
    w = jnp.transpose(w, (0, 2, 3, 1)).reshape(4 * Ch, KKC)
    w = jnp.pad(w, ((0, 0), (0, KKCp - KKC))).astype(jnp.bfloat16)

    b = jnp.concatenate([p["bxi"], p["bxf"], p["bxc"], p["bxo"]])
    b = b[:, None].astype(jnp.float32)                        # (4Ch, 1)

    def peephole(wp):                       # (1, Ch, H, W) -> (Ch, H*W), f32
        _, ch_, hh, ww = wp.shape
        return wp[0].reshape(ch_, hh * ww).astype(jnp.float32)

    return (w, b,
            peephole(p["wci"]),
            peephole(p["wcf"]),
            peephole(p["wco"]))


# ---------------------------------------------------------------------------
# Pure-JAX reference (mirrors the PyTorch forward exactly, NCHW, f32)
# ---------------------------------------------------------------------------

def reference_forward(x, h, c, p, pad):
    def conv(inp, w, b=None):
        out = lax.conv_general_dilated(
            inp, w, window_strides=(1, 1),
            padding=[(pad, pad), (pad, pad)],
            dimension_numbers=("NCHW", "OIHW", "NCHW"),
            precision=lax.Precision.HIGHEST)
        if b is not None:
            out = out + b[None, :, None, None]
        return out
    ci = jax.nn.sigmoid(conv(x, p["wxi"], p["bxi"]) + conv(h, p["whi"]) + c * p["wci"])
    cf = jax.nn.sigmoid(conv(x, p["wxf"], p["bxf"]) + conv(h, p["whf"]) + c * p["wcf"])
    cc = cf * c + ci * jnp.tanh(conv(x, p["wxc"], p["bxc"]) + conv(h, p["whc"]))
    co = jax.nn.sigmoid(conv(x, p["wxo"], p["bxo"]) + conv(h, p["who"]) + cc * p["wco"])
    ch = co * jnp.tanh(cc)
    return ch, cc


if __name__ == "__main__":
    B, Cin, Ch, H, W, K = 2, 4, 32, 16, 16, 3
    pad = (K - 1) // 2

    key = jax.random.PRNGKey(0)
    kx, kh, kc, kp = jax.random.split(key, 4)
    x = 0.5 * jax.random.normal(kx, (B, Cin, H, W), jnp.float32)
    h = 0.5 * jax.random.normal(kh, (B, Ch, H, W), jnp.float32)
    c = 0.5 * jax.random.normal(kc, (B, Ch, H, W), jnp.float32)

    torch_params = make_params(kp, Cin, Ch, K, H, W)
    kernel_params = pack_params_for_kernel(torch_params)

    fwd = jax.jit(functools.partial(conv_lstm_cell_forward, kernel_size=K))
    ch_out, cc_out = fwd(x, h, c, kernel_params)
    jax.block_until_ready((ch_out, cc_out))

    # Tolerance sized for bf16 MXU operands with f32 accumulation vs the f32
    # HIGHEST-precision reference.
    ch_ref, cc_ref = reference_forward(x, h, c, torch_params, pad)
    np.testing.assert_allclose(np.asarray(ch_out), np.asarray(ch_ref),
                               rtol=2e-2, atol=2e-2)
    np.testing.assert_allclose(np.asarray(cc_out), np.asarray(cc_ref),
                               rtol=2e-2, atol=2e-2)

    print("KERNEL_OK")
</pallas_src>

<mosaic_0001>
module attributes {stable_mosaic.version = 11 : i64} {
  func.func @conv_lstm_cell_kernel(%arg0: i32, %arg1: i32, %arg2: memref<1x384x256xbf16, #tpu.memory_space<vmem>>, %arg3: memref<1x32x256xf32, #tpu.memory_space<vmem>>, %arg4: memref<128x384xbf16, #tpu.memory_space<vmem>>, %arg5: memref<128x1xf32, #tpu.memory_space<vmem>>, %arg6: memref<32x256xf32, #tpu.memory_space<vmem>>, %arg7: memref<32x256xf32, #tpu.memory_space<vmem>>, %arg8: memref<32x256xf32, #tpu.memory_space<vmem>>, %arg9: memref<1x32x256xf32, #tpu.memory_space<vmem>>, %arg10: memref<1x32x256xf32, #tpu.memory_space<vmem>>) attributes {dimension_semantics = [#tpu.dimension_semantics<parallel>, #tpu.dimension_semantics<parallel>], iteration_bounds = array<i64: 2, 1>, scalar_prefetch = 0 : i64, scratch_operands = 0 : i64, tpu.core_type = #tpu.core_type<tc>, window_params = [{transform_indices = @transform_0, window_bounds = array<i64: 1, 384, 256>}, {transform_indices = @transform_1, window_bounds = array<i64: 1, 32, 256>}, {pipeline_mode = #tpu.pipeline_mode<synchronous>, transform_indices = @transform_2, window_bounds = array<i64: 128, 384>}, {pipeline_mode = #tpu.pipeline_mode<synchronous>, transform_indices = @transform_3, window_bounds = array<i64: 128, 1>}, {transform_indices = @transform_4, window_bounds = array<i64: 32, 256>}, {transform_indices = @transform_5, window_bounds = array<i64: 32, 256>}, {transform_indices = @transform_6, window_bounds = array<i64: 32, 256>}, {transform_indices = @transform_7, window_bounds = array<i64: 1, 32, 256>}, {transform_indices = @transform_8, window_bounds = array<i64: 1, 32, 256>}]} {
    %c0 = arith.constant 0 : index
    %c0_0 = arith.constant 0 : index
    %0 = vector.load %arg4[%c0, %c0_0] : memref<128x384xbf16, #tpu.memory_space<vmem>>, vector<128x384xbf16>
    %c0_1 = arith.constant 0 : index
    %c0_2 = arith.constant 0 : index
    %c0_3 = arith.constant 0 : index
    %1 = vector.load %arg2[%c0_1, %c0_2, %c0_3] : memref<1x384x256xbf16, #tpu.memory_space<vmem>>, vector<1x384x256xbf16>
    %2 = vector.shape_cast %1 : vector<1x384x256xbf16> to vector<384x256xbf16>
    %cst = arith.constant dense<0.000000e+00> : vector<128x256xf32>
    %3 = tpu.matmul %0, %2, %cst {dimension_numbers = #tpu.dot_dimension_numbers<[1], [0], [0], [1], [0, 0, 1, 1], [], []>} : vector<128x384xbf16>, vector<384x256xbf16>, vector<128x256xf32> -> vector<128x256xf32>
    %c0_4 = arith.constant 0 : index
    %c0_5 = arith.constant 0 : index
    %c0_6 = arith.constant 0 : index
    %4 = vector.load %arg3[%c0_4, %c0_5, %c0_6] : memref<1x32x256xf32, #tpu.memory_space<vmem>>, vector<1x32x256xf32>
    %5 = vector.shape_cast %4 : vector<1x32x256xf32> to vector<32x256xf32>
    %6 = vector.extract_strided_slice %3 {offsets = [0, 0], sizes = [32, 256], strides = [1, 1]} : vector<128x256xf32> to vector<32x256xf32>
    %c0_7 = arith.constant 0 : index
    %c0_8 = arith.constant 0 : index
    %7 = vector.load %arg5[%c0_7, %c0_8] : memref<128x1xf32, #tpu.memory_space<vmem>>, vector<32x1xf32>
    %8 = vector.broadcast %7 : vector<32x1xf32> to vector<32x256xf32>
    %9 = arith.addf %6, %8 : vector<32x256xf32>
    %10 = vector.extract_strided_slice %3 {offsets = [32, 0], sizes = [32, 256], strides = [1, 1]} : vector<128x256xf32> to vector<32x256xf32>
    %c32 = arith.constant 32 : index
    %c0_9 = arith.constant 0 : index
    %11 = vector.load %arg5[%c32, %c0_9] : memref<128x1xf32, #tpu.memory_space<vmem>>, vector<32x1xf32>
    %12 = vector.broadcast %11 : vector<32x1xf32> to vector<32x256xf32>
    %13 = arith.addf %10, %12 : vector<32x256xf32>
    %14 = vector.extract_strided_slice %3 {offsets = [64, 0], sizes = [32, 256], strides = [1, 1]} : vector<128x256xf32> to vector<32x256xf32>
    %c64 = arith.constant 64 : index
    %c0_10 = arith.constant 0 : index
    %15 = vector.load %arg5[%c64, %c0_10] : memref<128x1xf32, #tpu.memory_space<vmem>>, vector<32x1xf32>
    %16 = vector.broadcast %15 : vector<32x1xf32> to vector<32x256xf32>
    %17 = arith.addf %14, %16 : vector<32x256xf32>
    %18 = vector.extract_strided_slice %3 {offsets = [96, 0], sizes = [32, 256], strides = [1, 1]} : vector<128x256xf32> to vector<32x256xf32>
    %c96 = arith.constant 96 : index
    %c0_11 = arith.constant 0 : index
    %19 = vector.load %arg5[%c96, %c0_11] : memref<128x1xf32, #tpu.memory_space<vmem>>, vector<32x1xf32>
    %20 = vector.broadcast %19 : vector<32x1xf32> to vector<32x256xf32>
    %21 = arith.addf %18, %20 : vector<32x256xf32>
    %c0_12 = arith.constant 0 : index
    %c0_13 = arith.constant 0 : index
    %22 = vector.load %arg6[%c0_12, %c0_13] : memref<32x256xf32, #tpu.memory_space<vmem>>, vector<32x256xf32>
    %23 = arith.mulf %5, %22 : vector<32x256xf32>
    %24 = arith.addf %9, %23 : vector<32x256xf32>
    %25 = arith.negf %24 : vector<32x256xf32>
    %26 = math.exp %25 : vector<32x256xf32>
    %cst_14 = arith.constant 1.000000e+00 : f32
    %27 = vector.broadcast %cst_14 : f32 to vector<32x256xf32>
    %28 = arith.addf %27, %26 : vector<32x256xf32>
    %29 = arith.divf %27, %28 : vector<32x256xf32>
    %c0_15 = arith.constant 0 : index
    %c0_16 = arith.constant 0 : index
    %30 = vector.load %arg7[%c0_15, %c0_16] : memref<32x256xf32, #tpu.memory_space<vmem>>, vector<32x256xf32>
    %31 = arith.mulf %5, %30 : vector<32x256xf32>
    %32 = arith.addf %13, %31 : vector<32x256xf32>
    %33 = arith.negf %32 : vector<32x256xf32>
    %34 = math.exp %33 : vector<32x256xf32>
    %cst_17 = arith.constant 1.000000e+00 : f32
    %35 = vector.broadcast %cst_17 : f32 to vector<32x256xf32>
    %36 = arith.addf %35, %34 : vector<32x256xf32>
    %37 = arith.divf %35, %36 : vector<32x256xf32>
    %38 = arith.mulf %37, %5 : vector<32x256xf32>
    %39 = math.tanh %17 : vector<32x256xf32>
    %40 = arith.mulf %29, %39 : vector<32x256xf32>
    %41 = arith.addf %38, %40 : vector<32x256xf32>
    %c0_18 = arith.constant 0 : index
    %c0_19 = arith.constant 0 : index
    %42 = vector.load %arg8[%c0_18, %c0_19] : memref<32x256xf32, #tpu.memory_space<vmem>>, vector<32x256xf32>
    %43 = arith.mulf %41, %42 : vector<32x256xf32>
    %44 = arith.addf %21, %43 : vector<32x256xf32>
    %45 = arith.negf %44 : vector<32x256xf32>
    %46 = math.exp %45 : vector<32x256xf32>
    %cst_20 = arith.constant 1.000000e+00 : f32
    %47 = vector.broadcast %cst_20 : f32 to vector<32x256xf32>
    %48 = arith.addf %47, %46 : vector<32x256xf32>
    %49 = arith.divf %47, %48 : vector<32x256xf32>
    %50 = math.tanh %41 : vector<32x256xf32>
    %51 = arith.mulf %49, %50 : vector<32x256xf32>
    %c0_21 = arith.constant 0 : index
    %c0_22 = arith.constant 0 : index
    %c0_23 = arith.constant 0 : index
    %52 = vector.load %arg9[%c0_21, %c0_22, %c0_23] : memref<1x32x256xf32, #tpu.memory_space<vmem>>, vector<1x32x256xf32>
    %53 = vector.shape_cast %52 : vector<1x32x256xf32> to vector<32x256xf32>
    %54 = vector.shape_cast %51 : vector<32x256xf32> to vector<1x32x256xf32>
    tpu.vector_store %arg9[%c0_21, %c0_22, %c0_23], %54 {strides = array<i32>} : memref<1x32x256xf32, #tpu.memory_space<vmem>>, vector<1x32x256xf32>,
    %c0_24 = arith.constant 0 : index
    %c0_25 = arith.constant 0 : index
    %c0_26 = arith.constant 0 : index
    %55 = vector.load %arg10[%c0_24, %c0_25, %c0_26] : memref<1x32x256xf32, #tpu.memory_space<vmem>>, vector<1x32x256xf32>
    %56 = vector.shape_cast %55 : vector<1x32x256xf32> to vector<32x256xf32>
    %57 = vector.shape_cast %41 : vector<32x256xf32> to vector<1x32x256xf32>
    tpu.vector_store %arg10[%c0_24, %c0_25, %c0_26], %57 {strides = array<i32>} : memref<1x32x256xf32, #tpu.memory_space<vmem>>, vector<1x32x256xf32>,
    return
  }
  func.func @transform_0(%arg0: i32, %arg1: i32) -> (i32, i32, i32) {
    %c0_i32 = arith.constant 0 : i32
    %c0_i32_0 = arith.constant 0 : i32
    return %arg0, %c0_i32, %arg1 : i32, i32, i32
  }
  func.func @transform_1(%arg0: i32, %arg1: i32) -> (i32, i32, i32) {
    %c0_i32 = arith.constant 0 : i32
    %c0_i32_0 = arith.constant 0 : i32
    return %arg0, %c0_i32, %arg1 : i32, i32, i32
  }
  func.func @transform_2(%arg0: i32, %arg1: i32) -> (i32, i32) {
    %c0_i32 = arith.constant 0 : i32
    %c0_i32_0 = arith.constant 0 : i32
    %c0_i32_1 = arith.constant 0 : i32
    return %c0_i32, %c0_i32_0 : i32, i32
  }
  func.func @transform_3(%arg0: i32, %arg1: i32) -> (i32, i32) {
    %c0_i32 = arith.constant 0 : i32
    %c0_i32_0 = arith.constant 0 : i32
    %c0_i32_1 = arith.constant 0 : i32
    return %c0_i32, %c0_i32_0 : i32, i32
  }
  func.func @transform_4(%arg0: i32, %arg1: i32) -> (i32, i32) {
    %c0_i32 = arith.constant 0 : i32
    %c0_i32_0 = arith.constant 0 : i32
    return %c0_i32, %arg1 : i32, i32
  }
  func.func @transform_5(%arg0: i32, %arg1: i32) -> (i32, i32) {
    %c0_i32 = arith.constant 0 : i32
    %c0_i32_0 = arith.constant 0 : i32
    return %c0_i32, %arg1 : i32, i32
  }
  func.func @transform_6(%arg0: i32, %arg1: i32) -> (i32, i32) {
    %c0_i32 = arith.constant 0 : i32
    %c0_i32_0 = arith.constant 0 : i32
    return %c0_i32, %arg1 : i32, i32
  }
  func.func @transform_7(%arg0: i32, %arg1: i32) -> (i32, i32, i32) {
    %c0_i32 = arith.constant 0 : i32
    %c0_i32_0 = arith.constant 0 : i32
    return %arg0, %c0_i32, %arg1 : i32, i32, i32
  }
  func.func @transform_8(%arg0: i32, %arg1: i32) -> (i32, i32, i32) {
    %c0_i32 = arith.constant 0 : i32
    %c0_i32_0 = arith.constant 0 : i32
    return %arg0, %c0_i32, %arg1 : i32, i32, i32
  }
}

</mosaic_0001>

<bundles_post_ra>
// kernel: conv_lstm_cell_forward.1
= control target key start
LH: loop header
LB: loop body
LE: loop exit
PB: predicated region body
PF: predicated region fallthrough
CT: control target
= control target key end

     0   :  { %s2240_s27 = smov 0   ;;  %s2242_s28 = smov 0   ;;  %s2739_s0 = inlined_call_operand.vmem [shape: bf16[2,384,256], index: 0, kind: input, shape index: {}]   ;;  %s2740_s1 = inlined_call_operand.vmem [shape: f32[2,32,256], index: 1, kind: input, shape index: {}]   ;;  %s2741_s2 = inlined_call_operand.vmem [shape: bf16[128,384], index: 2, kind: input, shape index: {}]   ;;  %s2742_s3 = inlined_call_operand.vmem [shape: f32[128,1], index: 3, kind: input, shape index: {}]   ;;  %s2743_s4 = inlined_call_operand.vmem [shape: f32[32,256], index: 4, kind: input, shape index: {}]   ;;  %s2744_s5 = inlined_call_operand.vmem [shape: f32[32,256], index: 5, kind: input, shape index: {}]   ;;  %s2745_s6 = inlined_call_operand.vmem [shape: f32[32,256], index: 6, kind: input, shape index: {}]   ;;  %s2746_s7 = inlined_call_operand.vmem [shape: f32[2,32,256], index: 7, kind: output, shape index: {0}]   ;;  %s2747_s8 = inlined_call_operand.vmem [shape: f32[2,32,256], index: 8, kind: output, shape index: {1}]  }
   0x1   :  { %s2244_s29 = smov 0  }
   0x2 LB: > { %s31_s30 = sadd.s32 1, %s2188_s28  ;;  %p1769_p0 = scmp.ge.s32.totalorder %s2192_s29, 1  ;;  %s2192_s29 = sphi %s2244_s29, %s19_s29   ;;  %s2188_s28 = sphi %s2242_s28, %s2749_s28   ;;  %s2184_s27 = sphi %s2240_s27, %s2748_s27  }
   0x3   : > { %p33_p1 = scmp.ge.s32.totalorder %s31_s30, 2  ;;  %p338_p2 = scmp.lt.s32.totalorder %s2192_s29, 3 }
   0x5   : > { %s2751_s30 = smov (%p33_p1, %s31_s30), 0  ;;  %p339_p3 = pnand %p1769_p0, %p338_p2 }
   0x6   : > { %p414_p4 = scmp.lt.s32.totalorder (!%p339_p3), %s2184_s27, 1  ;;  %v2194_v0 = vmov (!%p339_p3), 0   ;;  %v2013_v1 = vld [vmem:[%s2741_s2 + $0x4] ss:$12 sps:$4 sm:$0xff] (!%p339_p3)   ;;  %v2010_v41 = vld [vmem:[%s2741_s2 + $0x8] ss:$12 sps:$4 sm:$0xff] (!%p339_p3)  }
   0x7   : > { %342 = sbr.rel (%p339_p3) target bundleno = 400 (0x190), region = 48  ;;  %1065 = vmatprep.mubr.bf16.mxu0 (!%p339_p3), %v2194_v0  ;;  %1937 = vset.pattern.permute.xlu1 (!%p339_p3), %v2194_v0  ;;  %v1156_v44 = vld [vmem:[%s2742_s3 + $0x10] sm:$0xff] (!%p339_p3)  ;;  %v1154_v45 = vld [vmem:[%s2742_s3] sm:$0xff] (!%p339_p3)  ;;  %v1157_v46 = vld [vmem:[%s2742_s3 + $0x18] sm:$0xff] (!%p339_p3) }
   0x8   : > { %1936 = vset.pattern.permute.xlu0 (!%p339_p3), %v2194_v0  ;;  %952 = vmatprep.mubr.bf16.mxu1 (!%p339_p3), %v2013_v1  ;;  %v1155_v48 = vld [vmem:[%s2742_s3 + $0x8] sm:$0xff] (!%p339_p3)  ;;  %v1186_v53 = vld [vmem:[%s2742_s3 + $0x20] sm:$0xff] (!%p339_p3)  ;;  %v1189_v55 = vld [vmem:[%s2742_s3 + $0x38] sm:$0xff] (!%p339_p3) }
   0x9   : > { %1170 = vperm.xlu1 (!%p339_p3), %1937, %v1156_v44   ;;  %1160 = vperm.xlu0 (!%p339_p3), %1936, %v1154_v45   ;;  %v2014_v50 = vld [vmem:[%s2741_s2 + $0x20] ss:$12 sps:$4 sm:$0xff] (!%p339_p3)   ;;  %v1188_v57 = vld [vmem:[%s2742_s3 + $0x30] sm:$0xff] (!%p339_p3)  ;;  %v2018_v59 = vld [vmem:[%s2741_s2 + $0x38] ss:$12 sps:$4 sm:$0xff] (!%p339_p3)  }
   0xa   : > { %v1187_v51 = vld [vmem:[%s2742_s3 + $0x28] sm:$0xff] (!%p339_p3)  ;;  %v1218_v62 = vld [vmem:[%s2742_s3 + $0x40] sm:$0xff] (!%p339_p3)  ;;  %v1221_v1 = vld [vmem:[%s2742_s3 + $0x58] sm:$0xff] (!%p339_p3) }
   0xb   : > { %v1219_v60 = vld [vmem:[%s2742_s3 + $0x48] sm:$0xff] (!%p339_p3)  ;;  %v1284_v44 = vld [vmem:[%s2743_s4 + $0x10] sm:$0xff] (!%p339_p3) }
   0xc   : > { %v2011_v63 = vld [vmem:[%s2741_s2] ss:$12 sps:$4 sm:$0xff] (!%p339_p3)  }
   0xd   : > { %1175 = vperm.xlu1 (!%p339_p3), %1937, %v1157_v46   ;;  %1165 = vperm.xlu0 (!%p339_p3), %1936, %v1155_v48  }
   0xe   : > { %s2753_s27 = smov (!%p414_p4, %s2184_s27), 1 }
   0xf   : > { %s1910_s11 = smul.u32 384, %s2753_s27  ;;  %s2449_s22 = sshll.u32 %s2753_s27, 6 }
  0x10   : > { %s2455_s25 = scalar_lea.vmem %s2740_s1, %s2449_s22  ;;  %s2633_s24 = scalar_lea.vmem %s2747_s8, %s2449_s22 }
  0x11   : > { %s2270_s14 = scalar_lea.vmem %s2739_s0, %s1910_s11  ;;  %1197 = vperm.xlu1 %1937, %v1187_v51   ;;  %1192 = vperm.xlu0 %1936, %v1186_v53   ;;  %v2485_v48 = vld [vmem:[%s2455_s25 + $0x18] sm:$0xff] }
  0x12   : > { %v1938_v2 = vld [vmem:[%s2270_s14 + $0x4] ss:$8 sps:$4 sm:$0xff]   ;;  %v1940_v3 = vld [vmem:[%s2270_s14] ss:$8 sps:$4 sm:$0xff]   ;;  %v1941_v4 = vld [vmem:[%s2270_s14 + $0x14] ss:$8 sps:$4 sm:$0xff]  }
  0x13   : > { %920 = vmatprep.subr.bf16.mxu1 %v1938_v2  ;;  %v1943_v5 = vld [vmem:[%s2270_s14 + $0x10] ss:$8 sps:$4 sm:$0xff]   ;;  %v1944_v6 = vld [vmem:[%s2270_s14 + $0x24] ss:$8 sps:$4 sm:$0xff]   ;;  %v1946_v7 = vld [vmem:[%s2270_s14 + $0x20] ss:$8 sps:$4 sm:$0xff]  }
  0x14   : > { %921 = vmatpush1.bf16.msra.mxu1 %v1940_v3  ;;  %v1947_v8 = vld [vmem:[%s2270_s14 + $0x34] ss:$8 sps:$4 sm:$0xff]   ;;  %v1949_v9 = vld [vmem:[%s2270_s14 + $0x30] ss:$8 sps:$4 sm:$0xff]   ;;  %v1962_v10 = vld [vmem:[%s2270_s14 + $0x104] ss:$8 sps:$4 sm:$0xff]  }
  0x15   : > { %922 = vmatprep.subr.bf16.mxu1 %v1941_v4  ;;  %v1964_v11 = vld [vmem:[%s2270_s14 + $0x100] ss:$8 sps:$4 sm:$0xff]   ;;  %v1950_v12 = vld [vmem:[%s2270_s14 + $0x44] ss:$8 sps:$4 sm:$0xff]   ;;  %1033 = vmatprep.subr.bf16.mxu0 %v1962_v10  ;;  %v1968_v13 = vld [vmem:[%s2270_s14 + $0x114] ss:$8 sps:$4 sm:$0xff]  }
  0x16   : > { %1034 = vmatpush1.bf16.msra.mxu0 %v1964_v11  ;;  %v1970_v14 = vld [vmem:[%s2270_s14 + $0x110] ss:$8 sps:$4 sm:$0xff]   ;;  %v1952_v15 = vld [vmem:[%s2270_s14 + $0x40] ss:$8 sps:$4 sm:$0xff]   ;;  %v1953_v16 = vld [vmem:[%s2270_s14 + $0x54] ss:$8 sps:$4 sm:$0xff]   ;;  %1207 = vperm.xlu1 %1937, %v1189_v55  }
  0x17   : > { %1035 = vmatprep.subr.bf16.mxu0 %v1968_v13  ;;  %v1974_v17 = vld [vmem:[%s2270_s14 + $0x124] ss:$8 sps:$4 sm:$0xff]   ;;  %v1976_v18 = vld [vmem:[%s2270_s14 + $0x120] ss:$8 sps:$4 sm:$0xff]   ;;  %v1955_v19 = vld [vmem:[%s2270_s14 + $0x50] ss:$8 sps:$4 sm:$0xff]   ;;  %1202 = vperm.xlu0 %1936, %v1188_v57  }
  0x18   : > { %923 = vmatpush1.bf16.msra.mxu1 %v1943_v5  ;;  %v1980_v20 = vld [vmem:[%s2270_s14 + $0x134] ss:$8 sps:$4 sm:$0xff]   ;;  %v1956_v21 = vld [vmem:[%s2270_s14 + $0x64] ss:$8 sps:$4 sm:$0xff]   ;;  %v1982_v22 = vld [vmem:[%s2270_s14 + $0x130] ss:$8 sps:$4 sm:$0xff]  }
  0x19   : > { %924 = vmatprep.subr.bf16.mxu1 %v1944_v6  ;;  %v1958_v23 = vld [vmem:[%s2270_s14 + $0x60] ss:$8 sps:$4 sm:$0xff]   ;;  %v1986_v24 = vld [vmem:[%s2270_s14 + $0x144] ss:$8 sps:$4 sm:$0xff]   ;;  %v1959_v25 = vld [vmem:[%s2270_s14 + $0x74] ss:$8 sps:$4 sm:$0xff]  }
  0x1a   : > { %1036 = vmatpush1.bf16.msra.mxu0 %v1970_v14  ;;  %v1988_v26 = vld [vmem:[%s2270_s14 + $0x140] ss:$8 sps:$4 sm:$0xff]   ;;  %v1961_v27 = vld [vmem:[%s2270_s14 + $0x70] ss:$8 sps:$4 sm:$0xff]   ;;  %v1992_v28 = vld [vmem:[%s2270_s14 + $0x154] ss:$8 sps:$4 sm:$0xff]   ;;  %1229 = vperm.xlu1 %1937, %v1219_v60  }
  0x1b   : > { %1037 = vmatprep.subr.bf16.mxu0 %v1974_v17  ;;  %v1965_v29 = vld [vmem:[%s2270_s14 + $0x84] ss:$8 sps:$4 sm:$0xff]   ;;  %v1994_v30 = vld [vmem:[%s2270_s14 + $0x150] ss:$8 sps:$4 sm:$0xff]   ;;  %v1967_v31 = vld [vmem:[%s2270_s14 + $0x80] ss:$8 sps:$4 sm:$0xff]   ;;  %1224 = vperm.xlu0 %1936, %v1218_v62  }
  0x1c   : > { %925 = vmatpush1.bf16.msra.mxu1 %v1946_v7  ;;  %v1998_v32 = vld [vmem:[%s2270_s14 + $0x164] ss:$8 sps:$4 sm:$0xff]   ;;  %v1971_v33 = vld [vmem:[%s2270_s14 + $0x94] ss:$8 sps:$4 sm:$0xff]   ;;  %v1973_v34 = vld [vmem:[%s2270_s14 + $0x90] ss:$8 sps:$4 sm:$0xff]  }
  0x1d   : > { %926 = vmatprep.subr.bf16.mxu1 %v1947_v8  ;;  %v2000_v35 = vld [vmem:[%s2270_s14 + $0x160] ss:$8 sps:$4 sm:$0xff]   ;;  %v2004_v36 = vld [vmem:[%s2270_s14 + $0x174] ss:$8 sps:$4 sm:$0xff]   ;;  %v1977_v37 = vld [vmem:[%s2270_s14 + $0xa4] ss:$8 sps:$4 sm:$0xff]  }
  0x1e   : > { %1038 = vmatpush1.bf16.msra.mxu0 %v1976_v18  ;;  %v2006_v38 = vld [vmem:[%s2270_s14 + $0x170] ss:$8 sps:$4 sm:$0xff]   ;;  %v1979_v39 = vld [vmem:[%s2270_s14 + $0xa0] ss:$8 sps:$4 sm:$0xff]   ;;  %v1983_v40 = vld [vmem:[%s2270_s14 + $0xb4] ss:$8 sps:$4 sm:$0xff]   ;;  %1239 = vperm.xlu1 %1937, %v1221_v1  }
  0x1f   : > { %1039 = vmatprep.subr.bf16.mxu0 %v1980_v20  ;;  %v1985_v42 = vld [vmem:[%s2270_s14 + $0xb0] ss:$8 sps:$4 sm:$0xff]   ;;  %v1989_v43 = vld [vmem:[%s2270_s14 + $0xc4] ss:$8 sps:$4 sm:$0xff]   ;;  %v1991_v47 = vld [vmem:[%s2270_s14 + $0xc0] ss:$8 sps:$4 sm:$0xff]  }
  0x20   : > { %927 = vmatpush1.bf16.msra.mxu1 %v1949_v9  ;;  %v1995_v49 = vld [vmem:[%s2270_s14 + $0xd4] ss:$8 sps:$4 sm:$0xff]   ;;  %v1997_v52 = vld [vmem:[%s2270_s14 + $0xd0] ss:$8 sps:$4 sm:$0xff]   ;;  %v2001_v54 = vld [vmem:[%s2270_s14 + $0xe4] ss:$8 sps:$4 sm:$0xff]  }
  0x21   : > { %928 = vmatprep.subr.bf16.mxu1 %v1950_v12  ;;  %v2003_v56 = vld [vmem:[%s2270_s14 + $0xe0] ss:$8 sps:$4 sm:$0xff]   ;;  %v2007_v58 = vld [vmem:[%s2270_s14 + $0xf4] ss:$8 sps:$4 sm:$0xff]   ;;  %v2009_v61 = vld [vmem:[%s2270_s14 + $0xf0] ss:$8 sps:$4 sm:$0xff]  }
  0x22   : > { %1040 = vmatpush1.bf16.msra.mxu0 %v1982_v22  ;;  %v2015_v2 = vld [vmem:[%s2741_s2 + $0x1c] ss:$12 sps:$4 sm:$0xff]   ;;  %v1220_v3 = vld [vmem:[%s2742_s3 + $0x50] sm:$0xff]  ;;  %v1250_v6 = vld [vmem:[%s2742_s3 + $0x60] sm:$0xff] }
  0x23   : > { %1041 = vmatprep.subr.bf16.mxu0 %v1986_v24  ;;  %v2022_v4 = vld [vmem:[%s2741_s2 + $0x50] ss:$12 sps:$4 sm:$0xff]   ;;  %1234 = vperm.xlu0 %1936, %v1220_v3   ;;  %v1251_v5 = vld [vmem:[%s2742_s3 + $0x68] sm:$0xff]  ;;  %v2017_v7 = vld [vmem:[%s2741_s2 + $0x18] ss:$12 sps:$4 sm:$0xff]  }
  0x24   : > { %929 = vmatpush1.bf16.msra.mxu1 %v1952_v15  ;;  %1261 = vperm.xlu1 %1937, %v1251_v5   ;;  %v1253_v8 = vld [vmem:[%s2742_s3 + $0x78] sm:$0xff]  ;;  %v2019_v9 = vld [vmem:[%s2741_s2 + $0x34] ss:$12 sps:$4 sm:$0xff]  }
  0x25   : > { %930 = vmatprep.subr.bf16.mxu1 %v1953_v16  ;;  %v1252_v10 = vld [vmem:[%s2742_s3 + $0x70] sm:$0xff]  ;;  %v2023_v13 = vld [vmem:[%s2741_s2 + $0x4c] ss:$12 sps:$4 sm:$0xff]  }
  0x26   : > { %1042 = vmatpush1.bf16.msra.mxu0 %v1988_v26  ;;  %v2026_v11 = vld [vmem:[%s2741_s2 + $0x68] ss:$12 sps:$4 sm:$0xff]   ;;  %v2021_v12 = vld [vmem:[%s2741_s2 + $0x30] ss:$12 sps:$4 sm:$0xff]   ;;  %v2030_v14 = vld [vmem:[%s2741_s2 + $0x80] ss:$12 sps:$4 sm:$0xff]  }
  0x27   : > { %1043 = vmatprep.subr.bf16.mxu0 %v1992_v28  ;;  %1256 = vperm.xlu0 %1936, %v1250_v6   ;;  %v2025_v15 = vld [vmem:[%s2741_s2 + $0x48] ss:$12 sps:$4 sm:$0xff]   ;;  %v2027_v16 = vld [vmem:[%s2741_s2 + $0x64] ss:$12 sps:$4 sm:$0xff]   ;;  %v2029_v18 = vld [vmem:[%s2741_s2 + $0x60] ss:$12 sps:$4 sm:$0xff]  }
  0x28   : > { %931 = vmatpush1.bf16.msra.mxu1 %v1955_v19  ;;  %1271 = vperm.xlu1 %1937, %v1253_v8   ;;  %v2036_v17 = vld [vmem:[%s2741_s2 + $0x98] ss:$12 sps:$4 sm:$0xff]   ;;  %v2031_v19 = vld [vmem:[%s2741_s2 + $0x7c] ss:$12 sps:$4 sm:$0xff]   ;;  %v2034_v22 = vld [vmem:[%s2741_s2 + $0x94] ss:$12 sps:$4 sm:$0xff]  }
  0x29   : > { %932 = vmatprep.subr.bf16.mxu1 %v1956_v21  ;;  %v2040_v20 = vld [vmem:[%s2741_s2 + $0xb0] ss:$12 sps:$4 sm:$0xff]   ;;  %v2033_v21 = vld [vmem:[%s2741_s2 + $0x78] ss:$12 sps:$4 sm:$0xff]   ;;  %v2041_v24 = vld [vmem:[%s2741_s2 + $0xa8] ss:$12 sps:$4 sm:$0xff]  }
  0x2a   : > { %1044 = vmatpush1.bf16.msra.mxu0 %v1994_v30  ;;  %v2500_v6 = vld [vmem:[%s2455_s25 + $0x20] sm:$0xff] }
  0x2b   : > { %1045 = vmatprep.subr.bf16.mxu0 %v1998_v32  ;;  %1266 = vperm.xlu0 %1936, %v1252_v10  }
  0x2c   : > { %933 = vmatpush1.bf16.msra.mxu1 %v1958_v23  ;;  %v2038_v23 = vld [vmem:[%s2741_s2 + $0xac] ss:$12 sps:$4 sm:$0xff]  }
  0x2d   : > { %934 = vmatprep.subr.bf16.mxu1 %v1959_v25 }
  0x2e   : > { %1046 = vmatpush1.bf16.msra.mxu0 %v2000_v35 }
  0x2f   : > { %1047 = vmatprep.subr.bf16.mxu0 %v2004_v36 }
  0x30   : > { %935 = vmatpush1.bf16.msra.mxu1 %v1961_v27 }
  0x31   : > { %936 = vmatprep.subr.bf16.mxu1 %v1965_v29 }
  0x32   : > { %1048 = vmatpush1.bf16.msra.mxu0 %v2006_v38  ;;  %v1282_v38 = vld [vmem:[%s2743_s4] sm:$0xff] }
  0x34   : > { %937 = vmatpush1.bf16.msra.mxu1 %v1967_v31 }
  0x35   : > { %938 = vmatprep.subr.bf16.mxu1 %v1971_v33  ;;  %1066 = vmatmul.mubr.bf16.vlgmr.msra.gmra.mrb[0].mxu0 %v2010_v41  ;;  %v1283_v41 = vld [vmem:[%s2743_s4 + $0x8] sm:$0xff] }
  0x36   : > { %1075 = vmatprep.mubr.bf16.mxu0 %v2194_v0 }
  0x38   : > { %939 = vmatpush1.bf16.msra.mxu1 %v1973_v34 }
  0x39   : > { %940 = vmatprep.subr.bf16.mxu1 %v1977_v37  ;;  %v2464_v37 = vld [vmem:[%s2455_s25] sm:$0xff] }
  0x3a   : > { %v1290_v46 = vmul.f32 %v1282_v38, %v2464_v37 }
  0x3c   : > { %941 = vmatpush1.bf16.msra.mxu1 %v1979_v39 }
  0x3d   : > { %942 = vmatprep.subr.bf16.mxu1 %v1983_v40  ;;  %1076 = vmatmul.mubr.bf16.gmra.mrb[4].mxu0 %v2014_v50  ;;  %v2472_v40 = vld [vmem:[%s2455_s25 + $0x8] sm:$0xff] }
  0x3e   : > { %1085 = vmatprep.mubr.bf16.mxu0 %v2194_v0  ;;  %v1291_v51 = vmul.f32 %v1283_v41, %v2472_v40 }
  0x40   : > { %943 = vmatpush1.bf16.msra.mxu1 %v1985_v42 }
  0x41   : > { %944 = vmatprep.subr.bf16.mxu1 %v1989_v43  ;;  %v2478_v43 = vld [vmem:[%s2455_s25 + $0x10] sm:$0xff] }
  0x42   : > { %v1292_v55 = vmul.f32 %v1284_v44, %v2478_v43 }
  0x44   : > { %945 = vmatpush1.bf16.msra.mxu1 %v1991_v47 }
  0x45   : > { %946 = vmatprep.subr.bf16.mxu1 %v1995_v49  ;;  %1086 = vmatmul.mubr.bf16.gmra.mrb[8].mxu0 %v2018_v59  ;;  %v1285_v49 = vld [vmem:[%s2743_s4 + $0x18] sm:$0xff] }
  0x46   : > { %1095 = vmatprep.mubr.bf16.mxu0 %v2194_v0 }
  0x48   : > { %947 = vmatpush1.bf16.msra.mxu1 %v1997_v52 }
  0x49   : > { %948 = vmatprep.subr.bf16.mxu1 %v2001_v54 }
  0x4c   : > { %949 = vmatpush1.bf16.msra.mxu1 %v2003_v56 }
  0x4d   : > { %950 = vmatprep.subr.bf16.mxu1 %v2007_v58  ;;  %1096 = vmatmul.mubr.bf16.gmra.mrb[12].mxu0 %v2022_v4 }
  0x4e   : > { %1105 = vmatprep.mubr.bf16.mxu0 %v2194_v0 }
  0x50   : > { %951 = vmatpush1.bf16.msra.mxu1 %v2009_v61  ;;  %v1293_v61 = vmul.f32 %v1285_v49, %v2485_v48 }
  0x53   : > { %953 = vmatmul.mubr.bf16.vlgmr.msra.gmra.mrb[0].mxu1 %v2011_v63 }
  0x54   : > { %962 = vmatprep.mubr.bf16.mxu1 %v2015_v2 }
  0x55   : > { %1106 = vmatmul.mubr.bf16.gmra.mrb[16].mxu0 %v2026_v11  ;;  %v2508_v11 = vld [vmem:[%s2455_s25 + $0x28] sm:$0xff] }
  0x56   : > { %1115 = vmatprep.mubr.bf16.mxu0 %v2194_v0 }
  0x5b   : > { %963 = vmatmul.mubr.bf16.gmra.mrb[4].mxu1 %v2017_v7  ;;  %v1286_v7 = vld [vmem:[%s2743_s4 + $0x20] sm:$0xff] }
  0x5c   : > { %972 = vmatprep.mubr.bf16.mxu1 %v2019_v9 }
  0x5d   : > { %1116 = vmatmul.mubr.bf16.gmra.mrb[20].mxu0 %v2030_v14 }
  0x5e   : > { %1125 = vmatprep.mubr.bf16.mxu0 %v2194_v0 }
  0x63   : > { %973 = vmatmul.mubr.bf16.gmra.mrb[8].mxu1 %v2021_v12  ;;  %v1287_v12 = vld [vmem:[%s2743_s4 + $0x28] sm:$0xff] }
  0x64   : > { %982 = vmatprep.mubr.bf16.mxu1 %v2023_v13 }
  0x65   : > { %1126 = vmatmul.mubr.bf16.gmra.mrb[24].mxu0 %v2036_v17  ;;  %v1288_v17 = vld [vmem:[%s2743_s4 + $0x30] sm:$0xff] }
  0x66   : > { %1135 = vmatprep.mubr.bf16.mxu0 %v2194_v0  ;;  %v2037_v0 = vld [vmem:[%s2741_s2 + $0x90] ss:$12 sps:$4 sm:$0xff]  }
  0x6b   : > { %983 = vmatmul.mubr.bf16.gmra.mrb[12].mxu1 %v2025_v15 }
  0x6c   : > { %992 = vmatprep.mubr.bf16.mxu1 %v2027_v16  ;;  %v2514_v16 = vld [vmem:[%s2455_s25 + $0x30] sm:$0xff] }
  0x6d   : > { %1136 = vmatmul.mubr.bf16.gmra.mrb[28].mxu0 %v2040_v20  ;;  %v1294_v20 = vmul.f32 %v1286_v7, %v2500_v6 }
  0x73   : > { %993 = vmatmul.mubr.bf16.gmra.mrb[16].mxu1 %v2029_v18 }
  0x74   : > { %1002 = vmatprep.mubr.bf16.mxu1 %v2031_v19 }
  0x7b   : > { %1003 = vmatmul.mubr.bf16.gmra.mrb[20].mxu1 %v2033_v21 }
  0x7c   : > { %1012 = vmatprep.mubr.bf16.mxu1 %v2034_v22  ;;  %v2521_v22 = vld [vmem:[%s2455_s25 + $0x38] sm:$0xff]  ;;  %s2719_s25 = scalar_lea.vmem %s2746_s7, %s2449_s22 }
  0x83   : > { %1013 = vmatmul.mubr.bf16.gmra.mrb[24].mxu1 %v2037_v0  ;;  %v1289_v0 = vld [vmem:[%s2743_s4 + $0x38] sm:$0xff] }
  0x84   : > { %1022 = vmatprep.mubr.bf16.mxu1 %v2038_v23 }
  0x88   : > { %v1161_v36 = vpop.permute.xlu0 %1160  ;;  %v1171_v3 = vpop.permute.xlu1 %1170 }
  0x8b   : > { %1023 = vmatmul.mubr.bf16.gmra.mrb[28].mxu1 %v2041_v24 }
  0x8c   : > { %v1166_v58 = vpop.permute.xlu0 %1165  ;;  %v1176_v41 = vpop.permute.xlu1 %1175 }
 0x108   : > { %v1067_v25 = vpop.f32.mrb[0].mxu0 }
 0x109   : > { %v1069_v26 = vpop.f32.mrb[1].mxu0 }
 0x10a   : > { %v1071_v27 = vpop.f32.mrb[2].mxu0 }
 0x10b   : > { %v1073_v28 = vpop.f32.mrb[3].mxu0 }
 0x110   : > { %v1077_v29 = vpop.f32.mrb[4].mxu0 }
 0x111   : > { %v1079_v30 = vpop.f32.mrb[5].mxu0 }
 0x112   : > { %v2444_v31 = vpop.f32.mrb[6].mxu0 }
 0x113   : > { %v2446_v32 = vpop.f32.mrb[7].mxu0 }
 0x118   : > { %v2457_v33 = vpop.f32.mrb[8].mxu0 }
 0x119   : > { %v2459_v34 = vpop.f32.mrb[9].mxu0 }
 0x11a   : > { %v2461_v35 = vpop.f32.mrb[10].mxu0 }
 0x11b   : > { %v2469_v39 = vpop.f32.mrb[11].mxu0 }
 0x120   : > { %v2492_v57 = vpop.f32.mrb[12].mxu0 }
 0x121   : > { %v2495_v62 = vpop.f32.mrb[13].mxu0 }
 0x122   : > { %v2497_v2 = vpop.f32.mrb[14].mxu0 }
 0x123   : > { %v2505_v8 = vpop.f32.mrb[15].mxu0 }
 0x126   : > { %v954_v42 = vpop.f32.mrb[0].mxu1 }
 0x127   : > { %v1068_v45 = vadd.f32 %v1067_v25, %v954_v42  ;;  %v956_v47 = vpop.f32.mrb[1].mxu1  ;;  %v1295_v25 = vmul.f32 %v1287_v12, %v2508_v11 }
 0x128   : > { %v1070_v50 = vadd.f32 %v1069_v26, %v956_v47  ;;  %v958_v52 = vpop.f32.mrb[2].mxu1  ;;  %v2529_v38 = vpop.f32.mrb[16].mxu0 }
 0x129   : > { %v1178_v53 = vadd.f32 %v1161_v36, %v1068_v45  ;;  %v1072_v54 = vadd.f32 %v1071_v27, %v958_v52  ;;  %v960_v56 = vpop.f32.mrb[3].mxu1  ;;  %v1297_v45 = vmul.f32 %v1289_v0, %v2521_v22 }
 0x12a   : > { %v1179_v59 = vadd.f32 %v1161_v36, %v1070_v50  ;;  %v1074_v60 = vadd.f32 %v1073_v28, %v960_v56 }
 0x12b   : > { %v1298_v63 = vadd.f32 %v1290_v46, %v1178_v53  ;;  %v1180_v1 = vadd.f32 %v1166_v58, %v1072_v54  ;;  %v2533_v46 = vpop.f32.mrb[17].mxu0  ;;  %v1355_v54 = vld [vmem:[%s2744_s5 + $0x8] sm:$0xff] }
 0x12c   : > { %v1299_v4 = vadd.f32 %v1291_v51, %v1179_v59  ;;  %v1181_v5 = vadd.f32 %v1166_v58, %v1074_v60  ;;  %v2535_v49 = vpop.f32.mrb[18].mxu0  ;;  %v1354_v51 = vld [vmem:[%s2744_s5] sm:$0xff]  ;;  %v1356_v59 = vld [vmem:[%s2744_s5 + $0x10] sm:$0xff]  ;;  %v1363_v7 = vmul.f32 %v1355_v54, %v2472_v40 }
 0x12d   : > { %v1849_v9 = vmul.f32 -1.442695, %v1298_v63  ;;  %v1300_v10 = vadd.f32 %v1292_v55, %v1180_v1  ;;  %v2540_v52 = vpop.f32.mrb[19].mxu0  ;;  %v1357_v1 = vld [vmem:[%s2744_s5 + $0x18] sm:$0xff] }
 0x12e   : > { %v1850_v13 = vmul.f32 -1.442695, %v1299_v4  ;;  %v1301_v14 = vadd.f32 %v1293_v61, %v1181_v5  ;;  %v964_v15 = vpop.f32.mrb[4].mxu1  ;;  %v1362_v61 = vmul.f32 %v1354_v51, %v2464_v37 }
 0x12f   : > { %2042 = vpow2.f32 %v1849_v9  ;;  %v1851_v18 = vmul.f32 -1.442695, %v1300_v10  ;;  %v1078_v19 = vadd.f32 %v1077_v29, %v964_v15  ;;  %v966_v21 = vpop.f32.mrb[5].mxu1  ;;  %v1296_v29 = vmul.f32 %v1288_v17, %v2514_v16  ;;  %v1358_v17 = vld [vmem:[%s2744_s5 + $0x20] sm:$0xff] }
 0x130   : > { %2044 = vpow2.f32 %v1850_v13  ;;  %v1852_v23 = vmul.f32 -1.442695, %v1301_v14  ;;  %v1080_v24 = vadd.f32 %v1079_v30, %v966_v21  ;;  %v968_v26 = vpop.f32.mrb[6].mxu1  ;;  %v1364_v14 = vmul.f32 %v1356_v59, %v2478_v43 }
 0x131   : > { %v1182_v27 = vadd.f32 %v1171_v3, %v1078_v19  ;;  %v1082_v28 = vadd.f32 %v2444_v31, %v968_v26  ;;  %v970_v36 = vpop.f32.mrb[7].mxu1  ;;  %2046 = vpow2.f32 %v1851_v18  ;;  %v2560_v18 = vpop.f32.mrb[20].mxu0 }
 0x132   : > { %v1183_v42 = vadd.f32 %v1171_v3, %v1080_v24  ;;  %v1084_v44 = vadd.f32 %v2446_v32, %v970_v36  ;;  %2048 = vpow2.f32 %v1852_v23  ;;  %v1193_v3 = vpop.permute.xlu0 %1192  ;;  %v1365_v23 = vmul.f32 %v1357_v1, %v2485_v48  ;;  %v2567_v24 = vpop.f32.mrb[21].mxu0 }
 0x133   : > { %v1302_v30 = vadd.f32 %v1294_v20, %v1182_v27  ;;  %v1184_v47 = vadd.f32 %v1176_v41, %v1082_v28  ;;  %v1198_v20 = vpop.permute.xlu1 %1197  ;;  %v1360_v28 = vld [vmem:[%s2744_s5 + $0x30] sm:$0xff] }
 0x134   : > { %v1303_v31 = vadd.f32 %v1295_v25, %v1183_v42  ;;  %v1185_v50 = vadd.f32 %v1176_v41, %v1084_v44  ;;  %v1366_v41 = vmul.f32 %v1358_v17, %v2500_v6  ;;  %v1361_v42 = vld [vmem:[%s2744_s5 + $0x38] sm:$0xff]  ;;  %v1368_v54 = vmul.f32 %v1360_v28, %v2514_v16 }
 0x135   : > { %v1853_v53 = vmul.f32 -1.442695, %v1302_v30  ;;  %v1304_v32 = vadd.f32 %v1296_v29, %v1184_v47  ;;  %v2572_v29 = vpop.f32.mrb[22].mxu0  ;;  %v1369_v59 = vmul.f32 %v1361_v42, %v2521_v22 }
 0x136   : > { %v1854_v55 = vmul.f32 -1.442695, %v1303_v31  ;;  %v1305_v56 = vadd.f32 %v1297_v45, %v1185_v50  ;;  %v974_v58 = vpop.f32.mrb[8].mxu1  ;;  %v2578_v44 = vpop.f32.mrb[23].mxu0 }
 0x137   : > { %2050 = vpow2.f32 %v1853_v53  ;;  %v1088_v60 = vadd.f32 %v2457_v33, %v974_v58  ;;  %v976_v63 = vpop.f32.mrb[9].mxu1  ;;  %v1855_v4 = vmul.f32 -1.442695, %v1304_v32 }
 0x138   : > { %2052 = vpow2.f32 %v1854_v55  ;;  %v1090_v5 = vadd.f32 %v2459_v34, %v976_v63  ;;  %v978_v9 = vpop.f32.mrb[10].mxu1  ;;  %v1856_v12 = vmul.f32 -1.442695, %v1305_v56 }
 0x139   : > { %v2043_v10 = vpop.eup %2042  ;;  %v1210_v13 = vadd.f32 %v1193_v3, %v1088_v60  ;;  %v1092_v33 = vadd.f32 %v2461_v35, %v978_v9  ;;  %v980_v15 = vpop.f32.mrb[11].mxu1  ;;  %v1359_v35 = vld [vmem:[%s2744_s5 + $0x28] sm:$0xff]  ;;  %2054 = vpow2.f32 %v1855_v4 }
 0x13a   : > { %v2045_v19 = vpop.eup %2044  ;;  %v1330_v34 = vadd.f32 1.0, %v2043_v10  ;;  %v1211_v21 = vadd.f32 %v1193_v3, %v1090_v5  ;;  %v1094_v0 = vadd.f32 %v2469_v39, %v980_v15  ;;  %2056 = vpow2.f32 %v1856_v12  ;;  %v1203_v60 = vpop.permute.xlu0 %1202 }
 0x13b   : > { %v1331_v25 = vadd.f32 1.0, %v2045_v19  ;;  %v1370_v26 = vadd.f32 %v1362_v61, %v1210_v13  ;;  %v1212_v27 = vadd.f32 %v1198_v20, %v1092_v33  ;;  %v2047_v45 = vpop.eup %2046  ;;  %v1367_v31 = vmul.f32 %v1359_v35, %v2508_v11  ;;  %v2586_v12 = vpop.f32.mrb[24].mxu0 }
 0x13c   : > { %v1371_v36 = vadd.f32 %v1363_v7, %v1211_v21  ;;  %v1213_v39 = vadd.f32 %v1198_v20, %v1094_v0  ;;  %v2049_v50 = vpop.eup %2048  ;;  %2058 = vrcp.f32 %v1330_v34  ;;  %v1332_v61 = vadd.f32 1.0, %v2047_v45  ;;  %v1208_v13 = vpop.permute.xlu1 %1207 }
 0x13d   : > { %v1857_v30 = vmul.f32 -1.442695, %v1370_v26  ;;  %v1372_v47 = vadd.f32 %v1364_v14, %v1212_v27  ;;  %2060 = vrcp.f32 %v1331_v25  ;;  %v1333_v5 = vadd.f32 1.0, %v2049_v50  ;;  %v2589_v17 = vpop.f32.mrb[25].mxu0 }
 0x13e   : > { %v1858_v51 = vmul.f32 -1.442695, %v1371_v36  ;;  %v1373_v53 = vadd.f32 %v1365_v23, %v1213_v39  ;;  %v984_v32 = vpop.f32.mrb[12].mxu1  ;;  %v2591_v34 = vpop.f32.mrb[26].mxu0 }
 0x13f   : > { %v1859_v55 = vmul.f32 -1.442695, %v1372_v47  ;;  %v1098_v56 = vadd.f32 %v2492_v57, %v984_v32  ;;  %v986_v58 = vpop.f32.mrb[13].mxu1  ;;  %2062 = vpow2.f32 %v1857_v30  ;;  %v2593_v0 = vpop.f32.mrb[27].mxu0 }
 0x140   : > { %v1860_v63 = vmul.f32 -1.442695, %v1373_v53  ;;  %v1100_v1 = vadd.f32 %v2495_v62, %v986_v58  ;;  %v988_v3 = vpop.f32.mrb[14].mxu1  ;;  %2064 = vpow2.f32 %v1858_v51  ;;  %v1225_v45 = vpop.permute.xlu0 %1224 }
 0x141   : > { %v2051_v4 = vpop.eup %2050  ;;  %v1214_v7 = vadd.f32 %v1203_v60, %v1098_v56  ;;  %v1102_v9 = vadd.f32 %v2497_v2, %v988_v3  ;;  %v990_v10 = vpop.f32.mrb[15].mxu1  ;;  %2066 = vpow2.f32 %v1859_v55 }
 0x142   : > { %v2053_v57 = vpop.eup %2052  ;;  %v1334_v33 = vadd.f32 1.0, %v2051_v4  ;;  %v1215_v14 = vadd.f32 %v1203_v60, %v1100_v1  ;;  %v1104_v15 = vadd.f32 %v2505_v8, %v990_v10  ;;  %2068 = vpow2.f32 %v1860_v63  ;;  %v1230_v1 = vpop.permute.xlu1 %1229 }
 0x143   : > { %v1335_v62 = vadd.f32 1.0, %v2053_v57  ;;  %v1374_v19 = vadd.f32 %v1366_v41, %v1214_v7  ;;  %v1216_v20 = vadd.f32 %v1208_v13, %v1102_v9  ;;  %2070 = vrcp.f32 %v1332_v61  ;;  %v2055_v25 = vpop.eup %2054 }
 0x144   : > { %v1375_v2 = vadd.f32 %v1367_v31, %v1215_v14  ;;  %v1217_v21 = vadd.f32 %v1208_v13, %v1104_v15  ;;  %2072 = vrcp.f32 %v1333_v5  ;;  %v2595_v28 = vpop.eup %2056  ;;  %v1235_v15 = vpop.permute.xlu0 %1234 }
 0x145   : > { %v1861_v23 = vmul.f32 -1.442695, %v1374_v19  ;;  %v1376_v35 = vadd.f32 %v1368_v54, %v1216_v20  ;;  %2074 = vrcp.f32 %v1334_v33  ;;  %v2604_v54 = vpop.f32.mrb[28].mxu0 }
 0x146   : > { %v1862_v26 = vmul.f32 -1.442695, %v1375_v2  ;;  %v1377_v8 = vadd.f32 %v1369_v59, %v1217_v21  ;;  %v994_v27 = vpop.f32.mrb[16].mxu1  ;;  %2076 = vrcp.f32 %v1335_v62  ;;  %v2598_v42 = vpop.eup %2058 }
 0x147   : > { %v1863_v36 = vmul.f32 -1.442695, %v1376_v35  ;;  %v1108_v39 = vadd.f32 %v2529_v38, %v994_v27  ;;  %v996_v41 = vpop.f32.mrb[17].mxu1  ;;  %2078 = vpow2.f32 %v1861_v23  ;;  %v2601_v50 = vpop.eup %2060 }
 0x148   : > { %v1864_v30 = vmul.f32 -1.442695, %v1377_v8  ;;  %v1110_v47 = vadd.f32 %v2533_v46, %v996_v41  ;;  %v998_v31 = vpop.f32.mrb[18].mxu1  ;;  %2080 = vpow2.f32 %v1862_v26  ;;  %v2607_v56 = vpop.f32.mrb[29].mxu0  ;;  %v1336_v8 = vadd.f32 1.0, %v2055_v25 }
 0x149   : > { %v1242_v51 = vadd.f32 %v1225_v45, %v1108_v39  ;;  %v1112_v53 = vadd.f32 %v2535_v49, %v998_v31  ;;  %v1000_v32 = vpop.f32.mrb[19].mxu1  ;;  %v2063_v55 = vpop.eup %2062  ;;  %2082 = vpow2.f32 %v1863_v36 }
 0x14a   : > { %v1114_v38 = vadd.f32 %v2540_v52, %v1000_v32  ;;  %v2065_v58 = vpop.eup %2064  ;;  %v1402_v59 = vadd.f32 1.0, %v2063_v55  ;;  %2084 = vpow2.f32 %v1864_v30  ;;  %v2609_v46 = vpop.f32.mrb[30].mxu0  ;;  %v1243_v4 = vadd.f32 %v1225_v45, %v1110_v47 }
 0x14b   : > { %v2067_v60 = vpop.eup %2066  ;;  %v1403_v61 = vadd.f32 1.0, %v2065_v58  ;;  %2086 = vtanh.f32 %v1242_v51  ;;  %v2611_v63 = vpop.f32.mrb[31].mxu0  ;;  %v1244_v7 = vadd.f32 %v1230_v1, %v1112_v53 }
 0x14c   : > { %v2069_v49 = vpop.eup %2068  ;;  %2088 = vrcp.f32 %v1402_v59  ;;  %v1404_v3 = vadd.f32 1.0, %v2067_v60  ;;  %v1245_v57 = vadd.f32 %v1230_v1, %v1114_v38  ;;  %v1240_v41 = vpop.permute.xlu1 %1239 }
 0x14d   : > { %v2613_v5 = vpop.eup %2070  ;;  %2090 = vrcp.f32 %v1403_v61  ;;  %v1405_v52 = vadd.f32 1.0, %v2069_v49 }
 0x14e   : > { %v1004_v9 = vpop.f32.mrb[20].mxu1  ;;  %v2615_v10 = vpop.eup %2072  ;;  %2092 = vrcp.f32 %v1404_v3 }
 0x14f   : > { %v1118_v13 = vadd.f32 %v2560_v18, %v1004_v9  ;;  %v1006_v33 = vpop.f32.mrb[21].mxu1  ;;  %v2618_v14 = vpop.eup %2074  ;;  %2094 = vrcp.f32 %v1405_v52 }
 0x150   : > { %v1120_v62 = vadd.f32 %v2567_v24, %v1006_v33  ;;  %v1008_v19 = vpop.f32.mrb[22].mxu1  ;;  %v2621_v20 = vpop.eup %2076  ;;  %2096 = vtanh.f32 %v1243_v4 }
 0x151   : > { %v1246_v2 = vadd.f32 %v1235_v15, %v1118_v13  ;;  %v1122_v21 = vadd.f32 %v2572_v29, %v1008_v19  ;;  %v1010_v23 = vpop.f32.mrb[23].mxu1  ;;  %v2079_v35 = vpop.eup %2078  ;;  %2098 = vtanh.f32 %v1244_v7 }
 0x152   : > { %v1124_v26 = vadd.f32 %v2578_v44, %v1010_v23  ;;  %v2081_v18 = vpop.eup %2080  ;;  %v1406_v27 = vadd.f32 1.0, %v2079_v35  ;;  %2100 = vtanh.f32 %v1245_v57  ;;  %v1247_v30 = vadd.f32 %v1235_v15, %v1120_v62 }
 0x153   : > { %v2083_v36 = vpop.eup %2082  ;;  %v1407_v39 = vadd.f32 1.0, %v2081_v18  ;;  %2102 = vtanh.f32 %v1246_v2  ;;  %v1248_v29 = vadd.f32 %v1240_v41, %v1122_v21  ;;  %v1460_v2 = vld [vmem:[%s2745_s6 + $0x10] sm:$0xff] }
 0x154   : > { %v2085_v24 = vpop.eup %2084  ;;  %2104 = vrcp.f32 %v1406_v27  ;;  %v1408_v45 = vadd.f32 1.0, %v2083_v36  ;;  %v1249_v38 = vadd.f32 %v1240_v41, %v1124_v26  ;;  %v1262_v27 = vpop.permute.xlu1 %1261 }
 0x155   : > { %v2087_v47 = vpop.eup %2086  ;;  %2106 = vrcp.f32 %v1407_v39  ;;  %v1409_v44 = vadd.f32 1.0, %v2085_v24 }
 0x156   : > { %v1014_v31 = vpop.f32.mrb[24].mxu1  ;;  %v2089_v51 = vpop.eup %2088  ;;  %2108 = vrcp.f32 %v1336_v8  ;;  %v1442_v53 = vmul.f32 %v2087_v47, %v2598_v42 }
 0x157   : > { %v1128_v25 = vadd.f32 %v2586_v12, %v1014_v31  ;;  %v1016_v32 = vpop.f32.mrb[25].mxu1  ;;  %v2091_v55 = vpop.eup %2090  ;;  %2110 = vrcp.f32 %v1408_v45  ;;  %v1426_v58 = vmul.f32 %v2089_v51, %v2464_v37  ;;  %v1458_v12 = vld [vmem:[%s2745_s6] sm:$0xff]  ;;  %v1337_v37 = vadd.f32 1.0, %v2595_v28 }
 0x158   : > { %v1130_v59 = vadd.f32 %v2589_v17, %v1016_v32  ;;  %v1018_v60 = vpop.f32.mrb[26].mxu1  ;;  %v2093_v61 = vpop.eup %2092  ;;  %2112 = vtanh.f32 %v1247_v30  ;;  %v1427_v4 = vmul.f32 %v2091_v55, %v2472_v40  ;;  %v1459_v40 = vld [vmem:[%s2745_s6 + $0x8] sm:$0xff] }
 0x159   : > { %v1132_v42 = vadd.f32 %v2591_v34, %v1018_v60  ;;  %v1020_v49 = vpop.f32.mrb[27].mxu1  ;;  %v2095_v1 = vpop.eup %2094  ;;  %2114 = vtanh.f32 %v1248_v29  ;;  %v2640_v3 = vadd.f32 %v1442_v53, %v1426_v58  ;;  %v1428_v9 = vmul.f32 %v2093_v61, %v2478_v43 }
 0x15a   : > { %v1257_v17 = vpop.permute.xlu0 %1256  ;;  %v2097_v52 = vpop.eup %2096  ;;  %2116 = vrcp.f32 %v1409_v44  ;;  %v1134_v57 = vadd.f32 %v2593_v0, %v1020_v49  ;;  %v1429_v33 = vmul.f32 %v2095_v1, %v2485_v48 }
 0x15b   : > { %v1274_v7 = vadd.f32 %v1257_v17, %v1128_v25  ;;  %v2099_v13 = vpop.eup %2098  ;;  %2118 = vtanh.f32 %v1249_v38  ;;  %v1466_v34 = vmul.f32 %v1458_v12, %v2640_v3  ;;  %1554 = vst [vmem:[%s2633_s24] sm:$0xff] %v2640_v3  ;;  %v1443_v28 = vmul.f32 %v2097_v52, %v2601_v50  ;;  %v1462_v25 = vld [vmem:[%s2745_s6 + $0x20] sm:$0xff] }
 0x15c   : > { %v2101_v15 = vpop.eup %2100  ;;  %v1444_v62 = vmul.f32 %v2099_v13, %v2613_v5  ;;  %2120 = vrcp.f32 %v1337_v37  ;;  %v1461_v5 = vld [vmem:[%s2745_s6 + $0x18] sm:$0xff]  ;;  %v1275_v39 = vadd.f32 %v1257_v17, %v1130_v59  ;;  %v1276_v30 = vadd.f32 %v1262_v27, %v1132_v42 }
 0x15d   : > { %v2103_v43 = vpop.eup %2102  ;;  %v1474_v0 = vadd.f32 %v1466_v34, %v1274_v7  ;;  %v2654_v19 = vadd.f32 %v1443_v28, %v1427_v4  ;;  %v1445_v50 = vmul.f32 %v2101_v15, %v2615_v10 }
 0x15e   : > { %v1024_v48 = vpop.f32.mrb[28].mxu1  ;;  %v2105_v21 = vpop.eup %2104  ;;  %v2660_v23 = vadd.f32 %v1444_v62, %v1428_v9  ;;  %v1446_v26 = vmul.f32 %v2103_v43, %v2618_v14 }
 0x15f   : > { %v1138_v35 = vadd.f32 %v2604_v54, %v1024_v48  ;;  %v1026_v18 = vpop.f32.mrb[29].mxu1  ;;  %v2107_v8 = vpop.eup %2106  ;;  %v1865_v36 = vmul.f32 -1.442695, %v1474_v0  ;;  %v1467_v10 = vmul.f32 %v1459_v40, %v2654_v19  ;;  %1555 = vst [vmem:[%s2633_s24 + $0x8] sm:$0xff] %v2654_v19  ;;  %v2670_v24 = vadd.f32 %v1445_v50, %v1429_v33  ;;  %v1465_v0 = vld [vmem:[%s2745_s6 + $0x38] sm:$0xff] }
 0x160   : > { %v1028_v41 = vpop.f32.mrb[30].mxu1  ;;  %v2109_v45 = vpop.eup %2108  ;;  %v1468_v47 = vmul.f32 %v1460_v2, %v2660_v23  ;;  %1556 = vst [vmem:[%s2633_s24 + $0x10] sm:$0xff] %v2660_v23  ;;  %v1277_v54 = vadd.f32 %v1262_v27, %v1134_v57  ;;  %v1430_v14 = vmul.f32 %v2105_v21, %v2500_v6  ;;  %v1140_v53 = vadd.f32 %v2607_v56, %v1026_v18  ;;  %v1463_v56 = vld [vmem:[%s2745_s6 + $0x28] sm:$0xff] }
 0x161   : > { %v1030_v29 = vpop.f32.mrb[31].mxu1  ;;  %v2111_v31 = vpop.eup %2110  ;;  %2122 = vpow2.f32 %v1865_v36  ;;  %v1475_v51 = vadd.f32 %v1467_v10, %v1275_v39  ;;  %v1469_v44 = vmul.f32 %v1461_v5, %v2670_v24  ;;  %1557 = vst [vmem:[%s2633_s24 + $0x18] sm:$0xff] %v2670_v24  ;;  %v1431_v6 = vmul.f32 %v2107_v8, %v2508_v11 }
 0x162   : > { %v2113_v32 = vpop.eup %2112  ;;  %v1476_v55 = vadd.f32 %v1468_v47, %v1276_v30  ;;  %v2683_v38 = vadd.f32 %v1446_v26, %v1430_v14  ;;  %v1267_v59 = vpop.permute.xlu0 %1266  ;;  %v1142_v11 = vadd.f32 %v2609_v46, %v1028_v41  ;;  %v1464_v46 = vld [vmem:[%s2745_s6 + $0x30] sm:$0xff]  ;;  %v1144_v28 = vadd.f32 %v2611_v63, %v1030_v29 }
 0x163   : > { %v2115_v58 = vpop.eup %2114  ;;  %v1866_v60 = vmul.f32 -1.442695, %v1475_v51  ;;  %v1477_v61 = vadd.f32 %v1469_v44, %v1277_v54  ;;  %v1447_v12 = vmul.f32 %v2113_v32, %v2621_v20  ;;  %v1278_v1 = vadd.f32 %v1267_v59, %v1138_v35  ;;  %v1272_v62 = vpop.permute.xlu1 %1271 }
 0x164   : > { %v2117_v42 = vpop.eup %2116  ;;  %v1867_v49 = vmul.f32 -1.442695, %v1476_v55  ;;  %v1470_v37 = vmul.f32 %v1462_v25, %v2683_v38  ;;  %1558 = vst [vmem:[%s2633_s24 + $0x20] sm:$0xff] %v2683_v38  ;;  %v1432_v20 = vmul.f32 %v2111_v31, %v2514_v16  ;;  %v1279_v9 = vadd.f32 %v1267_v59, %v1140_v53 }
 0x165   : > { %v2119_v17 = vpop.eup %2118  ;;  %2124 = vpow2.f32 %v1866_v60  ;;  %v1868_v4 = vmul.f32 -1.442695, %v1477_v61  ;;  %v2694_v52 = vadd.f32 %v1447_v12, %v1431_v6  ;;  %v1448_v57 = vmul.f32 %v2115_v58, %v2109_v45 }
 0x166   : > { %2126 = vpow2.f32 %v1867_v49  ;;  %v1478_v7 = vadd.f32 %v1470_v37, %v1278_v1  ;;  %v2121_v13 = vpop.eup %2120  ;;  %v1433_v33 = vmul.f32 %v2117_v42, %v2521_v22  ;;  %v1280_v2 = vadd.f32 %v1272_v62, %v1142_v11 }
 0x167   : > { %2128 = vpow2.f32 %v1868_v4  ;;  %v1471_v34 = vmul.f32 %v1463_v56, %v2694_v52  ;;  %1559 = vst [vmem:[%s2633_s24 + $0x28] sm:$0xff] %v2694_v52  ;;  %v1456_v15 = vadd.f32 %v1448_v57, %v1432_v20  ;;  %v1449_v40 = vmul.f32 %v2121_v13, %v2119_v17 }
 0x168   : > { %v1869_v16 = vmul.f32 -1.442695, %v1478_v7  ;;  %2130 = vtanh.f32 %v2640_v3  ;;  %v1281_v35 = vadd.f32 %v1272_v62, %v1144_v28 }
 0x169   : > { %v1479_v43 = vadd.f32 %v1471_v34, %v1279_v9  ;;  %v1472_v50 = vmul.f32 %v1464_v46, %v1456_v15  ;;  %1560 = vst [vmem:[%s2633_s24 + $0x30] sm:$0xff] %v1456_v15  ;;  %v1457_v48 = vadd.f32 %v1449_v40, %v1433_v33 }
 0x16a   : > { %2132 = vpow2.f32 %v1869_v16 }
 0x16b   : > { %v2123_v63 = vpop.eup %2122  ;;  %2134 = vtanh.f32 %v2654_v19  ;;  %v1870_v22 = vmul.f32 -1.442695, %v1479_v43  ;;  %v1480_v5 = vadd.f32 %v1472_v50, %v1280_v2  ;;  %v1473_v26 = vmul.f32 %v1465_v0, %v1457_v48  ;;  %1561 = vst [vmem:[%s2633_s24 + $0x38] sm:$0xff] %v1457_v48 }
 0x16c   : > { %v1506_v21 = vadd.f32 1.0, %v2123_v63 }
 0x16d   : > { %2136 = vpow2.f32 %v1870_v22  ;;  %v1871_v3 = vmul.f32 -1.442695, %v1480_v5  ;;  %v1481_v18 = vadd.f32 %v1473_v26, %v1281_v35 }
 0x16e   : > { %2138 = vrcp.f32 %v1506_v21 }
 0x16f   : > { %v2125_v8 = vpop.eup %2124  ;;  %2140 = vtanh.f32 %v2660_v23  ;;  %v1872_v19 = vmul.f32 -1.442695, %v1481_v18 }
 0x170   : > { %v2127_v27 = vpop.eup %2126  ;;  %v1507_v36 = vadd.f32 1.0, %v2125_v8  ;;  %2142 = vpow2.f32 %v1871_v3 }
 0x171   : > { %v2129_v39 = vpop.eup %2128  ;;  %v1508_v10 = vadd.f32 1.0, %v2127_v27  ;;  %2144 = vtanh.f32 %v2670_v24 }
 0x172   : > { %2146 = vrcp.f32 %v1507_v36  ;;  %v1509_v41 = vadd.f32 1.0, %v2129_v39  ;;  %v2131_v45 = vpop.eup %2130 }
 0x173   : > { %2148 = vrcp.f32 %v1508_v10 }
 0x174   : > { %v2133_v30 = vpop.eup %2132  ;;  %2150 = vrcp.f32 %v1509_v41 }
 0x175   : > { %v2135_v47 = vpop.eup %2134  ;;  %v1510_v54 = vadd.f32 1.0, %v2133_v30  ;;  %2152 = vpow2.f32 %v1872_v19 }
 0x176   : > { %2154 = vtanh.f32 %v2683_v38 }
 0x177   : > { %v2137_v23 = vpop.eup %2136  ;;  %2156 = vrcp.f32 %v1510_v54 }
 0x178   : > { %v2139_v14 = vpop.eup %2138  ;;  %v1511_v24 = vadd.f32 1.0, %v2137_v23  ;;  %2158 = vtanh.f32 %v2694_v52 }
 0x179   : > { %v2141_v29 = vpop.eup %2140  ;;  %v1538_v31 = vmul.f32 %v2139_v14, %v2131_v45 }
 0x17a   : > { %v2143_v51 = vpop.eup %2142  ;;  %2160 = vrcp.f32 %v1511_v24 }
 0x17b   : > { %v2145_v44 = vpop.eup %2144  ;;  %1546 = vst [vmem:[%s2719_s25] sm:$0xff] %v1538_v31  ;;  %v1512_v25 = vadd.f32 1.0, %v2143_v51  ;;  %2162 = vtanh.f32 %v1456_v15 }
 0x17c   : > { %v2147_v53 = vpop.eup %2146 }
 0x17d   : > { %v2149_v32 = vpop.eup %2148  ;;  %v1539_v55 = vmul.f32 %v2147_v53, %v2135_v47  ;;  %2164 = vrcp.f32 %v1512_v25 }
 0x17e   : > { %v2151_v38 = vpop.eup %2150  ;;  %v1540_v6 = vmul.f32 %v2149_v32, %v2141_v29  ;;  %2166 = vtanh.f32 %v1457_v48 }
 0x17f   : > { %v2153_v58 = vpop.eup %2152  ;;  %1547 = vst [vmem:[%s2719_s25 + $0x8] sm:$0xff] %v1539_v55  ;;  %v1541_v59 = vmul.f32 %v2151_v38, %v2145_v44 }
 0x180   : > { %v2155_v60 = vpop.eup %2154  ;;  %1548 = vst [vmem:[%s2719_s25 + $0x10] sm:$0xff] %v1540_v6  ;;  %v1513_v61 = vadd.f32 1.0, %v2153_v58 }
 0x181   : > { %v2157_v12 = vpop.eup %2156  ;;  %1549 = vst [vmem:[%s2719_s25 + $0x18] sm:$0xff] %v1541_v59 }
 0x182   : > { %v1542_v42 = vmul.f32 %v2157_v12, %v2155_v60  ;;  %2168 = vrcp.f32 %v1513_v61  ;;  %v2159_v49 = vpop.eup %2158 }
 0x184   : > { %v2161_v1 = vpop.eup %2160  ;;  %1550 = vst [vmem:[%s2719_s25 + $0x20] sm:$0xff] %v1542_v42 }
 0x185   : > { %v1543_v37 = vmul.f32 %v2161_v1, %v2159_v49  ;;  %v2163_v56 = vpop.eup %2162 }
 0x187   : > { %v2165_v11 = vpop.eup %2164  ;;  %1551 = vst [vmem:[%s2719_s25 + $0x28] sm:$0xff] %v1543_v37 }
 0x188   : > { %v1544_v17 = vmul.f32 %v2165_v11, %v2163_v56  ;;  %v2167_v4 = vpop.eup %2166 }
 0x18a   : > { %1552 = vst [vmem:[%s2719_s25 + $0x30] sm:$0xff] %v1544_v17 }
 0x18c   : > { %v2169_v52 = vpop.eup %2168 }
 0x18d   : > { %v1545_v20 = vmul.f32 %v2169_v52, %v2167_v4 }
 0x18f   : > { %1553 = vst [vmem:[%s2719_s25 + $0x38] sm:$0xff] %v1545_v20 }
 0x190 PF: > { %s19_s29 = sadd.s32 1, %s2192_s29   ;;  %s2748_s27 = smov %s2188_s28 }
 0x191   : > { %p16_p5 = scmp.ge.s32.totalorder %s19_s29, 4   ;;  %s2749_s28 = smov %s2751_s30 }
 0x193   :  { %18 = sbr.rel (!%p16_p5) target bundleno = 2 (0x2), region = 102 }

</bundles_post_ra>
